<compile_context>
chip_gen: v6e
topology: v6e:2x2x1
jax: 0.10.0
libtpu: 0.0.40
codegen_flags: <defaults>
</compile_context>

<pallas_src>
import functools

import jax
import jax.numpy as jnp
from jax.experimental import pallas as pl
from jax.experimental.pallas import tpu as pltpu

_TAPS = tuple((ky, kx) for ky in range(3) for kx in range(3))


def _conv_block_kernel(x_ref, m_ref, w1_ref, b1_ref, w2_ref, b2_ref, o_ref,
                       h1_ref, *, band_h, w_pad):
    """One (image, row-band) per grid step; both convs fused.

    x_ref  : (1, 1, Cin, (BH+6)*WP)  flattened zero-padded input band (+halo)
    m_ref  : (1, 1, (BH+3)*WP)       0/1 validity mask for the conv1 band grid
    w1_ref : (9, Cout, Cin)          conv1 weights, one (Cout, Cin) slab per tap
    b1_ref : (Cout, 1)
    w2_ref : (9, Cout, Cout)
    b2_ref : (Cout, 1)
    o_ref  : (1, 1, Cout, BH*WP)     flattened output band (lane-dense)
    h1_ref : VMEM (Cout, (BH+3)*WP)  conv1 activation band (+1-row halo)
    """
    BH, WP = band_h, w_pad
    LH = (BH + 3) * WP          # conv1 positions computed (band + halo + slack)
    LOUT = BH * WP              # conv2 positions computed (band)

    # ---- conv1 + ReLU over the padded band grid (no scatter, no zero sweep) --
    acc1 = None
    for t, (ky, kx) in enumerate(_TAPS):
        s = ky * WP + kx                           # static flat tap offset
        slab = x_ref[0, 0, :, s:s + LH]            # (Cin, LH) contiguous slice
        p = jnp.dot(w1_ref[t], slab, preferred_element_type=jnp.float32)
        acc1 = p if acc1 is None else acc1 + p
    # mask zeroes the padding border and out-of-image rows -> exact SAME padding
    h1 = jnp.maximum(acc1 + b1_ref[...], 0.0) * m_ref[0]
    h1_ref[...] = h1.astype(h1_ref.dtype)          # stays in VMEM, never hits HBM

    # ---- conv2 + ReLU over the band -----------------------------------------
    acc2 = None
    for t, (ky, kx) in enumerate(_TAPS):
        s = ky * WP + kx
        slab = h1_ref[:, s:s + LOUT]               # (Cout, LOUT)
        p = jnp.dot(w2_ref[t], slab, preferred_element_type=jnp.float32)
        acc2 = p if acc2 is None else acc2 + p
    o_ref[0, 0] = jnp.maximum(acc2 + b2_ref[...], 0.0).astype(o_ref.dtype)


def conv_block_pallas(x_nchw, w1, b1, w2, b2, *, band_h=None,
                      compute_dtype=jnp.float32):
    """Fused (3x3 conv + ReLU) x 2.  NCHW in / NCHW out (no layout transposes).

    w1: (3,3,Cin,Cout) HWIO, b1: (Cout,), w2: (3,3,Cout,Cout), b2: (Cout,).
    """
    N, Cin, H, W = x_nchw.shape
    Cout = w1.shape[-1]
    if band_h is None:
        band_h = min(H, 32)     # TODO(synk): derive from per-generation VMEM budget
    BH = int(band_h)
    nbands = pl.cdiv(H, BH)
    Hc = nbands * BH            # rows actually computed (>= H; extras sliced off)
    WP = W + 4                  # padded row width (needs >= W+3 for the flat-shift trick)
    LIN = (BH + 6) * WP
    LH = (BH + 3) * WP
    LOUT = BH * WP

    # ---- per-band padded/flattened input, halo rows duplicated (XLA side) ----
    xp = jnp.pad(x_nchw, ((0, 0), (0, 0), (2, Hc + 4 - H), (2, WP - W - 2)))
    xb = jnp.stack([xp[:, :, b * BH:b * BH + BH + 6, :] for b in range(nbands)],
                   axis=1)                                    # (N, nb, Cin, BH+6, WP)
    xb = xb.reshape(N, nbands, Cin, LIN).astype(compute_dtype)

    # ---- validity mask for the conv1 band grid (zero padding + ragged rows) --
    y1 = jnp.arange(BH + 3)[None, :, None]
    xc = jnp.arange(WP)[None, None, :]
    bb = jnp.arange(nbands)[:, None, None]
    grow = bb * BH + y1 - 1                                   # global h1 row index
    mask = (grow >= 0) & (grow < H) & (xc >= 1) & (xc <= W)
    mask = mask.astype(jnp.float32).reshape(nbands, 1, LH)

    # ---- weights: HWIO (3,3,Ci,Co) -> per-tap (9, Co, Ci); biases -> (Co, 1) --
    w1t = jnp.transpose(w1, (0, 1, 3, 2)).reshape(9, Cout, Cin).astype(compute_dtype)
    w2t = jnp.transpose(w2, (0, 1, 3, 2)).reshape(9, Cout, Cout).astype(compute_dtype)
    b1r = b1.reshape(Cout, 1).astype(jnp.float32)
    b2r = b2.reshape(Cout, 1).astype(jnp.float32)

    kernel = functools.partial(_conv_block_kernel, band_h=BH, w_pad=WP)
    out = pl.pallas_call(
        kernel,
        out_shape=jax.ShapeDtypeStruct((N, nbands, Cout, LOUT), x_nchw.dtype),
        grid=(N, nbands),
        in_specs=[
            pl.BlockSpec((1, 1, Cin, LIN), lambda n, b: (n, b, 0, 0)),
            pl.BlockSpec((1, 1, LH), lambda n, b: (b, 0, 0)),
            pl.BlockSpec((9, Cout, Cin), lambda n, b: (0, 0, 0)),
            pl.BlockSpec((Cout, 1), lambda n, b: (0, 0)),
            pl.BlockSpec((9, Cout, Cout), lambda n, b: (0, 0, 0)),
            pl.BlockSpec((Cout, 1), lambda n, b: (0, 0)),
        ],
        out_specs=pl.BlockSpec((1, 1, Cout, LOUT), lambda n, b: (n, b, 0, 0)),
        scratch_shapes=[pltpu.VMEM((Cout, LH), compute_dtype)],
        compiler_params=pltpu.CompilerParams(
            dimension_semantics=("parallel", "parallel")),
    )(xb, mask, w1t, b1r, w2t, b2r)

    # ---- lane-dense kernel output -> NCHW (pure XLA layout plumbing) ---------
    out = out.reshape(N, nbands, Cout, BH, WP)
    out = jnp.transpose(out, (0, 2, 1, 3, 4)).reshape(N, Cout, Hc, WP)
    return out[:, :, :H, :W]


def init_conv_block_params(key, ch_in, ch_out, dtype=jnp.float32):
    """Deterministic parameter init (shapes match nn.Conv2d(.., k=3), HWIO)."""
    k1, k2, k3, k4 = jax.random.split(key, 4)
    w1 = jax.random.normal(k1, (3, 3, ch_in, ch_out), dtype) * 0.1
    b1 = jax.random.normal(k2, (ch_out,), dtype) * 0.1
    w2 = jax.random.normal(k3, (3, 3, ch_out, ch_out), dtype) * 0.1
    b2 = jax.random.normal(k4, (ch_out,), dtype) * 0.1
    return {"w1": w1, "b1": b1, "w2": w2, "b2": b2}


@functools.partial(jax.jit, static_argnames=("band_h", "compute_dtype"))
def conv_block_forward(x_nchw, params, *, band_h=8, compute_dtype=jnp.float32):
    """Forward pass equivalent to the PyTorch conv_block (NCHW in / NCHW out)."""
    return conv_block_pallas(x_nchw, params["w1"], params["b1"],
                             params["w2"], params["b2"],
                             band_h=band_h, compute_dtype=compute_dtype)


def _reference_forward(x_nchw, params):
    """Pure-JAX reference (lax conv) for correctness checking."""
    x = jnp.transpose(x_nchw, (0, 2, 3, 1))
    dn = ("NHWC", "HWIO", "NHWC")
    x = jax.lax.conv_general_dilated(x, params["w1"], (1, 1), "SAME",
                                     dimension_numbers=dn)
    x = jax.nn.relu(x + params["b1"])
    x = jax.lax.conv_general_dilated(x, params["w2"], (1, 1), "SAME",
                                     dimension_numbers=dn)
    x = jax.nn.relu(x + params["b2"])
    return jnp.transpose(x, (0, 3, 1, 2))


if __name__ == "__main__":
    key = jax.random.PRNGKey(0)
    kx_, kp = jax.random.split(key)

    N, C_IN, C_OUT, H, W = 2, 4, 8, 16, 16
    x = jax.random.normal(kx_, (N, C_IN, H, W), jnp.float32)
    params = init_conv_block_params(kp, C_IN, C_OUT)

    ref = _reference_forward(x, params)

    # Exact-parity f32 path.  band_h=8 exercises the 2-band halo seam,
    # band_h=5 exercises the ragged last band + out-of-image row masking.
    for bh in (8, 5):
        out = conv_block_forward(x, params, band_h=bh, compute_dtype=jnp.float32)
        out = jax.block_until_ready(out)
        assert out.shape == (N, C_OUT, H, W), out.shape
        assert jnp.allclose(out, ref, atol=1e-4, rtol=1e-4), f"f32 mismatch bh={bh}"

    # bf16 MXU-operand path (per perf review); f32 accumulate, looser tolerance.
    out_bf16 = conv_block_forward(x, params, band_h=8,
                                  compute_dtype=jnp.bfloat16)
    out_bf16 = jax.block_until_ready(out_bf16)
    assert jnp.allclose(out_bf16, ref, atol=5e-2, rtol=5e-2), "bf16 mismatch"

    print("KERNEL_OK")
</pallas_src>

<mosaic_0001>
module attributes {stable_mosaic.version = 11 : i64} {
  func.func @_conv_block_kernel(%arg0: i32, %arg1: i32, %arg2: memref<1x1x4x280xf32, #tpu.memory_space<vmem>>, %arg3: memref<1x1x220xf32, #tpu.memory_space<vmem>>, %arg4: memref<9x8x4xf32, #tpu.memory_space<vmem>>, %arg5: memref<8x1xf32, #tpu.memory_space<vmem>>, %arg6: memref<9x8x8xf32, #tpu.memory_space<vmem>>, %arg7: memref<8x1xf32, #tpu.memory_space<vmem>>, %arg8: memref<1x1x8x160xf32, #tpu.memory_space<vmem>>, %arg9: memref<8x220xf32, #tpu.memory_space<vmem>>) attributes {dimension_semantics = [#tpu.dimension_semantics<parallel>, #tpu.dimension_semantics<parallel>], iteration_bounds = array<i64: 2, 2>, scalar_prefetch = 0 : i64, scratch_operands = 1 : i64, tpu.core_type = #tpu.core_type<tc>, window_params = [{transform_indices = @transform_0, window_bounds = array<i64: 1, 1, 4, 280>}, {transform_indices = @transform_1, window_bounds = array<i64: 1, 1, 220>}, {pipeline_mode = #tpu.pipeline_mode<synchronous>, transform_indices = @transform_2, window_bounds = array<i64: 9, 8, 4>}, {pipeline_mode = #tpu.pipeline_mode<synchronous>, transform_indices = @transform_3, window_bounds = array<i64: 8, 1>}, {pipeline_mode = #tpu.pipeline_mode<synchronous>, transform_indices = @transform_4, window_bounds = array<i64: 9, 8, 8>}, {pipeline_mode = #tpu.pipeline_mode<synchronous>, transform_indices = @transform_5, window_bounds = array<i64: 8, 1>}, {transform_indices = @transform_6, window_bounds = array<i64: 1, 1, 8, 160>}]} {
    %c0 = arith.constant 0 : index
    %c0_0 = arith.constant 0 : index
    %c0_1 = arith.constant 0 : index
    %c0_2 = arith.constant 0 : index
    %0 = vector.load %arg2[%c0, %c0_0, %c0_1, %c0_2] : memref<1x1x4x280xf32, #tpu.memory_space<vmem>>, vector<1x1x4x220xf32>
    %1 = vector.shape_cast %0 : vector<1x1x4x220xf32> to vector<4x220xf32>
    %c0_3 = arith.constant 0 : index
    %c0_4 = arith.constant 0 : index
    %c0_5 = arith.constant 0 : index
    %2 = vector.load %arg4[%c0_3, %c0_4, %c0_5] : memref<9x8x4xf32, #tpu.memory_space<vmem>>, vector<1x8x4xf32>
    %3 = vector.shape_cast %2 : vector<1x8x4xf32> to vector<8x4xf32>
    %cst = arith.constant dense<0.000000e+00> : vector<8x220xf32>
    %4 = tpu.matmul %3, %1, %cst {dimension_numbers = #tpu.dot_dimension_numbers<[1], [0], [0], [1], [0, 0, 1, 1], [], []>} : vector<8x4xf32>, vector<4x220xf32>, vector<8x220xf32> -> vector<8x220xf32>
    %c0_6 = arith.constant 0 : index
    %c0_7 = arith.constant 0 : index
    %c0_8 = arith.constant 0 : index
    %c1 = arith.constant 1 : index
    %5 = vector.load %arg2[%c0_6, %c0_7, %c0_8, %c1] : memref<1x1x4x280xf32, #tpu.memory_space<vmem>>, vector<1x1x4x220xf32>
    %6 = vector.shape_cast %5 : vector<1x1x4x220xf32> to vector<4x220xf32>
    %c1_9 = arith.constant 1 : index
    %c0_10 = arith.constant 0 : index
    %c0_11 = arith.constant 0 : index
    %7 = vector.load %arg4[%c1_9, %c0_10, %c0_11] : memref<9x8x4xf32, #tpu.memory_space<vmem>>, vector<1x8x4xf32>
    %8 = vector.shape_cast %7 : vector<1x8x4xf32> to vector<8x4xf32>
    %cst_12 = arith.constant dense<0.000000e+00> : vector<8x220xf32>
    %9 = tpu.matmul %8, %6, %cst_12 {dimension_numbers = #tpu.dot_dimension_numbers<[1], [0], [0], [1], [0, 0, 1, 1], [], []>} : vector<8x4xf32>, vector<4x220xf32>, vector<8x220xf32> -> vector<8x220xf32>
    %10 = arith.addf %4, %9 : vector<8x220xf32>
    %c0_13 = arith.constant 0 : index
    %c0_14 = arith.constant 0 : index
    %c0_15 = arith.constant 0 : index
    %c2 = arith.constant 2 : index
    %11 = vector.load %arg2[%c0_13, %c0_14, %c0_15, %c2] : memref<1x1x4x280xf32, #tpu.memory_space<vmem>>, vector<1x1x4x220xf32>
    %12 = vector.shape_cast %11 : vector<1x1x4x220xf32> to vector<4x220xf32>
    %c2_16 = arith.constant 2 : index
    %c0_17 = arith.constant 0 : index
    %c0_18 = arith.constant 0 : index
    %13 = vector.load %arg4[%c2_16, %c0_17, %c0_18] : memref<9x8x4xf32, #tpu.memory_space<vmem>>, vector<1x8x4xf32>
    %14 = vector.shape_cast %13 : vector<1x8x4xf32> to vector<8x4xf32>
    %cst_19 = arith.constant dense<0.000000e+00> : vector<8x220xf32>
    %15 = tpu.matmul %14, %12, %cst_19 {dimension_numbers = #tpu.dot_dimension_numbers<[1], [0], [0], [1], [0, 0, 1, 1], [], []>} : vector<8x4xf32>, vector<4x220xf32>, vector<8x220xf32> -> vector<8x220xf32>
    %16 = arith.addf %10, %15 : vector<8x220xf32>
    %c0_20 = arith.constant 0 : index
    %c0_21 = arith.constant 0 : index
    %c0_22 = arith.constant 0 : index
    %c20 = arith.constant 20 : index
    %17 = vector.load %arg2[%c0_20, %c0_21, %c0_22, %c20] : memref<1x1x4x280xf32, #tpu.memory_space<vmem>>, vector<1x1x4x220xf32>
    %18 = vector.shape_cast %17 : vector<1x1x4x220xf32> to vector<4x220xf32>
    %c3 = arith.constant 3 : index
    %c0_23 = arith.constant 0 : index
    %c0_24 = arith.constant 0 : index
    %19 = vector.load %arg4[%c3, %c0_23, %c0_24] : memref<9x8x4xf32, #tpu.memory_space<vmem>>, vector<1x8x4xf32>
    %20 = vector.shape_cast %19 : vector<1x8x4xf32> to vector<8x4xf32>
    %cst_25 = arith.constant dense<0.000000e+00> : vector<8x220xf32>
    %21 = tpu.matmul %20, %18, %cst_25 {dimension_numbers = #tpu.dot_dimension_numbers<[1], [0], [0], [1], [0, 0, 1, 1], [], []>} : vector<8x4xf32>, vector<4x220xf32>, vector<8x220xf32> -> vector<8x220xf32>
    %22 = arith.addf %16, %21 : vector<8x220xf32>
    %c0_26 = arith.constant 0 : index
    %c0_27 = arith.constant 0 : index
    %c0_28 = arith.constant 0 : index
    %c21 = arith.constant 21 : index
    %23 = vector.load %arg2[%c0_26, %c0_27, %c0_28, %c21] : memref<1x1x4x280xf32, #tpu.memory_space<vmem>>, vector<1x1x4x220xf32>
    %24 = vector.shape_cast %23 : vector<1x1x4x220xf32> to vector<4x220xf32>
    %c4 = arith.constant 4 : index
    %c0_29 = arith.constant 0 : index
    %c0_30 = arith.constant 0 : index
    %25 = vector.load %arg4[%c4, %c0_29, %c0_30] : memref<9x8x4xf32, #tpu.memory_space<vmem>>, vector<1x8x4xf32>
    %26 = vector.shape_cast %25 : vector<1x8x4xf32> to vector<8x4xf32>
    %cst_31 = arith.constant dense<0.000000e+00> : vector<8x220xf32>
    %27 = tpu.matmul %26, %24, %cst_31 {dimension_numbers = #tpu.dot_dimension_numbers<[1], [0], [0], [1], [0, 0, 1, 1], [], []>} : vector<8x4xf32>, vector<4x220xf32>, vector<8x220xf32> -> vector<8x220xf32>
    %28 = arith.addf %22, %27 : vector<8x220xf32>
    %c0_32 = arith.constant 0 : index
    %c0_33 = arith.constant 0 : index
    %c0_34 = arith.constant 0 : index
    %c22 = arith.constant 22 : index
    %29 = vector.load %arg2[%c0_32, %c0_33, %c0_34, %c22] : memref<1x1x4x280xf32, #tpu.memory_space<vmem>>, vector<1x1x4x220xf32>
    %30 = vector.shape_cast %29 : vector<1x1x4x220xf32> to vector<4x220xf32>
    %c5 = arith.constant 5 : index
    %c0_35 = arith.constant 0 : index
    %c0_36 = arith.constant 0 : index
    %31 = vector.load %arg4[%c5, %c0_35, %c0_36] : memref<9x8x4xf32, #tpu.memory_space<vmem>>, vector<1x8x4xf32>
    %32 = vector.shape_cast %31 : vector<1x8x4xf32> to vector<8x4xf32>
    %cst_37 = arith.constant dense<0.000000e+00> : vector<8x220xf32>
    %33 = tpu.matmul %32, %30, %cst_37 {dimension_numbers = #tpu.dot_dimension_numbers<[1], [0], [0], [1], [0, 0, 1, 1], [], []>} : vector<8x4xf32>, vector<4x220xf32>, vector<8x220xf32> -> vector<8x220xf32>
    %34 = arith.addf %28, %33 : vector<8x220xf32>
    %c0_38 = arith.constant 0 : index
    %c0_39 = arith.constant 0 : index
    %c0_40 = arith.constant 0 : index
    %c40 = arith.constant 40 : index
    %35 = vector.load %arg2[%c0_38, %c0_39, %c0_40, %c40] : memref<1x1x4x280xf32, #tpu.memory_space<vmem>>, vector<1x1x4x220xf32>
    %36 = vector.shape_cast %35 : vector<1x1x4x220xf32> to vector<4x220xf32>
    %c6 = arith.constant 6 : index
    %c0_41 = arith.constant 0 : index
    %c0_42 = arith.constant 0 : index
    %37 = vector.load %arg4[%c6, %c0_41, %c0_42] : memref<9x8x4xf32, #tpu.memory_space<vmem>>, vector<1x8x4xf32>
    %38 = vector.shape_cast %37 : vector<1x8x4xf32> to vector<8x4xf32>
    %cst_43 = arith.constant dense<0.000000e+00> : vector<8x220xf32>
    %39 = tpu.matmul %38, %36, %cst_43 {dimension_numbers = #tpu.dot_dimension_numbers<[1], [0], [0], [1], [0, 0, 1, 1], [], []>} : vector<8x4xf32>, vector<4x220xf32>, vector<8x220xf32> -> vector<8x220xf32>
    %40 = arith.addf %34, %39 : vector<8x220xf32>
    %c0_44 = arith.constant 0 : index
    %c0_45 = arith.constant 0 : index
    %c0_46 = arith.constant 0 : index
    %c41 = arith.constant 41 : index
    %41 = vector.load %arg2[%c0_44, %c0_45, %c0_46, %c41] : memref<1x1x4x280xf32, #tpu.memory_space<vmem>>, vector<1x1x4x220xf32>
    %42 = vector.shape_cast %41 : vector<1x1x4x220xf32> to vector<4x220xf32>
    %c7 = arith.constant 7 : index
    %c0_47 = arith.constant 0 : index
    %c0_48 = arith.constant 0 : index
    %43 = vector.load %arg4[%c7, %c0_47, %c0_48] : memref<9x8x4xf32, #tpu.memory_space<vmem>>, vector<1x8x4xf32>
    %44 = vector.shape_cast %43 : vector<1x8x4xf32> to vector<8x4xf32>
    %cst_49 = arith.constant dense<0.000000e+00> : vector<8x220xf32>
    %45 = tpu.matmul %44, %42, %cst_49 {dimension_numbers = #tpu.dot_dimension_numbers<[1], [0], [0], [1], [0, 0, 1, 1], [], []>} : vector<8x4xf32>, vector<4x220xf32>, vector<8x220xf32> -> vector<8x220xf32>
    %46 = arith.addf %40, %45 : vector<8x220xf32>
    %c0_50 = arith.constant 0 : index
    %c0_51 = arith.constant 0 : index
    %c0_52 = arith.constant 0 : index
    %c42 = arith.constant 42 : index
    %47 = vector.load %arg2[%c0_50, %c0_51, %c0_52, %c42] : memref<1x1x4x280xf32, #tpu.memory_space<vmem>>, vector<1x1x4x220xf32>
    %48 = vector.shape_cast %47 : vector<1x1x4x220xf32> to vector<4x220xf32>
    %c8 = arith.constant 8 : index
    %c0_53 = arith.constant 0 : index
    %c0_54 = arith.constant 0 : index
    %49 = vector.load %arg4[%c8, %c0_53, %c0_54] : memref<9x8x4xf32, #tpu.memory_space<vmem>>, vector<1x8x4xf32>
    %50 = vector.shape_cast %49 : vector<1x8x4xf32> to vector<8x4xf32>
    %cst_55 = arith.constant dense<0.000000e+00> : vector<8x220xf32>
    %51 = tpu.matmul %50, %48, %cst_55 {dimension_numbers = #tpu.dot_dimension_numbers<[1], [0], [0], [1], [0, 0, 1, 1], [], []>} : vector<8x4xf32>, vector<4x220xf32>, vector<8x220xf32> -> vector<8x220xf32>
    %52 = arith.addf %46, %51 : vector<8x220xf32>
    %c0_56 = arith.constant 0 : index
    %c0_57 = arith.constant 0 : index
    %53 = vector.load %arg5[%c0_56, %c0_57] : memref<8x1xf32, #tpu.memory_space<vmem>>, vector<8x1xf32>
    %54 = vector.broadcast %53 : vector<8x1xf32> to vector<8x220xf32>
    %55 = arith.addf %52, %54 : vector<8x220xf32>
    %cst_58 = arith.constant 0.000000e+00 : f32
    %56 = vector.broadcast %cst_58 : f32 to vector<8x220xf32>
    %57 = arith.maximumf %55, %56 : vector<8x220xf32>
    %c0_59 = arith.constant 0 : index
    %c0_60 = arith.constant 0 : index
    %c0_61 = arith.constant 0 : index
    %58 = vector.load %arg3[%c0_59, %c0_60, %c0_61] : memref<1x1x220xf32, #tpu.memory_space<vmem>>, vector<1x1x220xf32>
    %59 = vector.shape_cast %58 : vector<1x1x220xf32> to vector<1x220xf32>
    %60 = vector.broadcast %59 : vector<1x220xf32> to vector<8x220xf32>
    %61 = arith.mulf %57, %60 : vector<8x220xf32>
    %c0_62 = arith.constant 0 : index
    %c0_63 = arith.constant 0 : index
    %62 = vector.load %arg9[%c0_62, %c0_63] : memref<8x220xf32, #tpu.memory_space<vmem>>, vector<8x220xf32>
    tpu.vector_store %arg9[%c0_62, %c0_63], %61 {strides = array<i32>} : memref<8x220xf32, #tpu.memory_space<vmem>>, vector<8x220xf32>,
    %c0_64 = arith.constant 0 : index
    %c0_65 = arith.constant 0 : index
    %63 = vector.load %arg9[%c0_64, %c0_65] : memref<8x220xf32, #tpu.memory_space<vmem>>, vector<8x160xf32>
    %c0_66 = arith.constant 0 : index
    %c0_67 = arith.constant 0 : index
    %c0_68 = arith.constant 0 : index
    %64 = vector.load %arg6[%c0_66, %c0_67, %c0_68] : memref<9x8x8xf32, #tpu.memory_space<vmem>>, vector<1x8x8xf32>
    %65 = vector.shape_cast %64 : vector<1x8x8xf32> to vector<8x8xf32>
    %cst_69 = arith.constant dense<0.000000e+00> : vector<8x160xf32>
    %66 = tpu.matmul %65, %63, %cst_69 {dimension_numbers = #tpu.dot_dimension_numbers<[1], [0], [0], [1], [0, 0, 1, 1], [], []>} : vector<8x8xf32>, vector<8x160xf32>, vector<8x160xf32> -> vector<8x160xf32>
    %c0_70 = arith.constant 0 : index
    %c1_71 = arith.constant 1 : index
    %67 = vector.load %arg9[%c0_70, %c1_71] : memref<8x220xf32, #tpu.memory_space<vmem>>, vector<8x160xf32>
    %c1_72 = arith.constant 1 : index
    %c0_73 = arith.constant 0 : index
    %c0_74 = arith.constant 0 : index
    %68 = vector.load %arg6[%c1_72, %c0_73, %c0_74] : memref<9x8x8xf32, #tpu.memory_space<vmem>>, vector<1x8x8xf32>
    %69 = vector.shape_cast %68 : vector<1x8x8xf32> to vector<8x8xf32>
    %cst_75 = arith.constant dense<0.000000e+00> : vector<8x160xf32>
    %70 = tpu.matmul %69, %67, %cst_75 {dimension_numbers = #tpu.dot_dimension_numbers<[1], [0], [0], [1], [0, 0, 1, 1], [], []>} : vector<8x8xf32>, vector<8x160xf32>, vector<8x160xf32> -> vector<8x160xf32>
    %71 = arith.addf %66, %70 : vector<8x160xf32>
    %c0_76 = arith.constant 0 : index
    %c2_77 = arith.constant 2 : index
    %72 = vector.load %arg9[%c0_76, %c2_77] : memref<8x220xf32, #tpu.memory_space<vmem>>, vector<8x160xf32>
    %c2_78 = arith.constant 2 : index
    %c0_79 = arith.constant 0 : index
    %c0_80 = arith.constant 0 : index
    %73 = vector.load %arg6[%c2_78, %c0_79, %c0_80] : memref<9x8x8xf32, #tpu.memory_space<vmem>>, vector<1x8x8xf32>
    %74 = vector.shape_cast %73 : vector<1x8x8xf32> to vector<8x8xf32>
    %cst_81 = arith.constant dense<0.000000e+00> : vector<8x160xf32>
    %75 = tpu.matmul %74, %72, %cst_81 {dimension_numbers = #tpu.dot_dimension_numbers<[1], [0], [0], [1], [0, 0, 1, 1], [], []>} : vector<8x8xf32>, vector<8x160xf32>, vector<8x160xf32> -> vector<8x160xf32>
    %76 = arith.addf %71, %75 : vector<8x160xf32>
    %c0_82 = arith.constant 0 : index
    %c20_83 = arith.constant 20 : index
    %77 = vector.load %arg9[%c0_82, %c20_83] : memref<8x220xf32, #tpu.memory_space<vmem>>, vector<8x160xf32>
    %c3_84 = arith.constant 3 : index
    %c0_85 = arith.constant 0 : index
    %c0_86 = arith.constant 0 : index
    %78 = vector.load %arg6[%c3_84, %c0_85, %c0_86] : memref<9x8x8xf32, #tpu.memory_space<vmem>>, vector<1x8x8xf32>
    %79 = vector.shape_cast %78 : vector<1x8x8xf32> to vector<8x8xf32>
    %cst_87 = arith.constant dense<0.000000e+00> : vector<8x160xf32>
    %80 = tpu.matmul %79, %77, %cst_87 {dimension_numbers = #tpu.dot_dimension_numbers<[1], [0], [0], [1], [0, 0, 1, 1], [], []>} : vector<8x8xf32>, vector<8x160xf32>, vector<8x160xf32> -> vector<8x160xf32>
    %81 = arith.addf %76, %80 : vector<8x160xf32>
    %c0_88 = arith.constant 0 : index
    %c21_89 = arith.constant 21 : index
    %82 = vector.load %arg9[%c0_88, %c21_89] : memref<8x220xf32, #tpu.memory_space<vmem>>, vector<8x160xf32>
    %c4_90 = arith.constant 4 : index
    %c0_91 = arith.constant 0 : index
    %c0_92 = arith.constant 0 : index
    %83 = vector.load %arg6[%c4_90, %c0_91, %c0_92] : memref<9x8x8xf32, #tpu.memory_space<vmem>>, vector<1x8x8xf32>
    %84 = vector.shape_cast %83 : vector<1x8x8xf32> to vector<8x8xf32>
    %cst_93 = arith.constant dense<0.000000e+00> : vector<8x160xf32>
    %85 = tpu.matmul %84, %82, %cst_93 {dimension_numbers = #tpu.dot_dimension_numbers<[1], [0], [0], [1], [0, 0, 1, 1], [], []>} : vector<8x8xf32>, vector<8x160xf32>, vector<8x160xf32> -> vector<8x160xf32>
    %86 = arith.addf %81, %85 : vector<8x160xf32>
    %c0_94 = arith.constant 0 : index
    %c22_95 = arith.constant 22 : index
    %87 = vector.load %arg9[%c0_94, %c22_95] : memref<8x220xf32, #tpu.memory_space<vmem>>, vector<8x160xf32>
    %c5_96 = arith.constant 5 : index
    %c0_97 = arith.constant 0 : index
    %c0_98 = arith.constant 0 : index
    %88 = vector.load %arg6[%c5_96, %c0_97, %c0_98] : memref<9x8x8xf32, #tpu.memory_space<vmem>>, vector<1x8x8xf32>
    %89 = vector.shape_cast %88 : vector<1x8x8xf32> to vector<8x8xf32>
    %cst_99 = arith.constant dense<0.000000e+00> : vector<8x160xf32>
    %90 = tpu.matmul %89, %87, %cst_99 {dimension_numbers = #tpu.dot_dimension_numbers<[1], [0], [0], [1], [0, 0, 1, 1], [], []>} : vector<8x8xf32>, vector<8x160xf32>, vector<8x160xf32> -> vector<8x160xf32>
    %91 = arith.addf %86, %90 : vector<8x160xf32>
    %c0_100 = arith.constant 0 : index
    %c40_101 = arith.constant 40 : index
    %92 = vector.load %arg9[%c0_100, %c40_101] : memref<8x220xf32, #tpu.memory_space<vmem>>, vector<8x160xf32>
    %c6_102 = arith.constant 6 : index
    %c0_103 = arith.constant 0 : index
    %c0_104 = arith.constant 0 : index
    %93 = vector.load %arg6[%c6_102, %c0_103, %c0_104] : memref<9x8x8xf32, #tpu.memory_space<vmem>>, vector<1x8x8xf32>
    %94 = vector.shape_cast %93 : vector<1x8x8xf32> to vector<8x8xf32>
    %cst_105 = arith.constant dense<0.000000e+00> : vector<8x160xf32>
    %95 = tpu.matmul %94, %92, %cst_105 {dimension_numbers = #tpu.dot_dimension_numbers<[1], [0], [0], [1], [0, 0, 1, 1], [], []>} : vector<8x8xf32>, vector<8x160xf32>, vector<8x160xf32> -> vector<8x160xf32>
    %96 = arith.addf %91, %95 : vector<8x160xf32>
    %c0_106 = arith.constant 0 : index
    %c41_107 = arith.constant 41 : index
    %97 = vector.load %arg9[%c0_106, %c41_107] : memref<8x220xf32, #tpu.memory_space<vmem>>, vector<8x160xf32>
    %c7_108 = arith.constant 7 : index
    %c0_109 = arith.constant 0 : index
    %c0_110 = arith.constant 0 : index
    %98 = vector.load %arg6[%c7_108, %c0_109, %c0_110] : memref<9x8x8xf32, #tpu.memory_space<vmem>>, vector<1x8x8xf32>
    %99 = vector.shape_cast %98 : vector<1x8x8xf32> to vector<8x8xf32>
    %cst_111 = arith.constant dense<0.000000e+00> : vector<8x160xf32>
    %100 = tpu.matmul %99, %97, %cst_111 {dimension_numbers = #tpu.dot_dimension_numbers<[1], [0], [0], [1], [0, 0, 1, 1], [], []>} : vector<8x8xf32>, vector<8x160xf32>, vector<8x160xf32> -> vector<8x160xf32>
    %101 = arith.addf %96, %100 : vector<8x160xf32>
    %c0_112 = arith.constant 0 : index
    %c42_113 = arith.constant 42 : index
    %102 = vector.load %arg9[%c0_112, %c42_113] : memref<8x220xf32, #tpu.memory_space<vmem>>, vector<8x160xf32>
    %c8_114 = arith.constant 8 : index
    %c0_115 = arith.constant 0 : index
    %c0_116 = arith.constant 0 : index
    %103 = vector.load %arg6[%c8_114, %c0_115, %c0_116] : memref<9x8x8xf32, #tpu.memory_space<vmem>>, vector<1x8x8xf32>
    %104 = vector.shape_cast %103 : vector<1x8x8xf32> to vector<8x8xf32>
    %cst_117 = arith.constant dense<0.000000e+00> : vector<8x160xf32>
    %105 = tpu.matmul %104, %102, %cst_117 {dimension_numbers = #tpu.dot_dimension_numbers<[1], [0], [0], [1], [0, 0, 1, 1], [], []>} : vector<8x8xf32>, vector<8x160xf32>, vector<8x160xf32> -> vector<8x160xf32>
    %106 = arith.addf %101, %105 : vector<8x160xf32>
    %c0_118 = arith.constant 0 : index
    %c0_119 = arith.constant 0 : index
    %107 = vector.load %arg7[%c0_118, %c0_119] : memref<8x1xf32, #tpu.memory_space<vmem>>, vector<8x1xf32>
    %108 = vector.broadcast %107 : vector<8x1xf32> to vector<8x160xf32>
    %109 = arith.addf %106, %108 : vector<8x160xf32>
    %cst_120 = arith.constant 0.000000e+00 : f32
    %110 = vector.broadcast %cst_120 : f32 to vector<8x160xf32>
    %111 = arith.maximumf %109, %110 : vector<8x160xf32>
    %c0_121 = arith.constant 0 : index
    %c0_122 = arith.constant 0 : index
    %c0_123 = arith.constant 0 : index
    %c0_124 = arith.constant 0 : index
    %112 = vector.load %arg8[%c0_121, %c0_122, %c0_123, %c0_124] : memref<1x1x8x160xf32, #tpu.memory_space<vmem>>, vector<1x1x8x160xf32>
    %113 = vector.shape_cast %112 : vector<1x1x8x160xf32> to vector<8x160xf32>
    %114 = vector.shape_cast %111 : vector<8x160xf32> to vector<1x1x8x160xf32>
    tpu.vector_store %arg8[%c0_121, %c0_122, %c0_123, %c0_124], %114 {strides = array<i32>} : memref<1x1x8x160xf32, #tpu.memory_space<vmem>>, vector<1x1x8x160xf32>,
    return
  }
  func.func @transform_0(%arg0: i32, %arg1: i32) -> (i32, i32, i32, i32) {
    %c0_i32 = arith.constant 0 : i32
    %c0_i32_0 = arith.constant 0 : i32
    %c0_i32_1 = arith.constant 0 : i32
    return %arg0, %arg1, %c0_i32, %c0_i32_0 : i32, i32, i32, i32
  }
  func.func @transform_1(%arg0: i32, %arg1: i32) -> (i32, i32, i32) {
    %c0_i32 = arith.constant 0 : i32
    %c0_i32_0 = arith.constant 0 : i32
    %c0_i32_1 = arith.constant 0 : i32
    return %arg1, %c0_i32, %c0_i32_0 : i32, i32, i32
  }
  func.func @transform_2(%arg0: i32, %arg1: i32) -> (i32, i32, i32) {
    %c0_i32 = arith.constant 0 : i32
    %c0_i32_0 = arith.constant 0 : i32
    %c0_i32_1 = arith.constant 0 : i32
    %c0_i32_2 = arith.constant 0 : i32
    return %c0_i32, %c0_i32_0, %c0_i32_1 : i32, i32, i32
  }
  func.func @transform_3(%arg0: i32, %arg1: i32) -> (i32, i32) {
    %c0_i32 = arith.constant 0 : i32
    %c0_i32_0 = arith.constant 0 : i32
    %c0_i32_1 = arith.constant 0 : i32
    return %c0_i32, %c0_i32_0 : i32, i32
  }
  func.func @transform_4(%arg0: i32, %arg1: i32) -> (i32, i32, i32) {
    %c0_i32 = arith.constant 0 : i32
    %c0_i32_0 = arith.constant 0 : i32
    %c0_i32_1 = arith.constant 0 : i32
    %c0_i32_2 = arith.constant 0 : i32
    return %c0_i32, %c0_i32_0, %c0_i32_1 : i32, i32, i32
  }
  func.func @transform_5(%arg0: i32, %arg1: i32) -> (i32, i32) {
    %c0_i32 = arith.constant 0 : i32
    %c0_i32_0 = arith.constant 0 : i32
    %c0_i32_1 = arith.constant 0 : i32
    return %c0_i32, %c0_i32_0 : i32, i32
  }
  func.func @transform_6(%arg0: i32, %arg1: i32) -> (i32, i32, i32, i32) {
    %c0_i32 = arith.constant 0 : i32
    %c0_i32_0 = arith.constant 0 : i32
    %c0_i32_1 = arith.constant 0 : i32
    return %arg0, %arg1, %c0_i32, %c0_i32_0 : i32, i32, i32, i32
  }
}

</mosaic_0001>

<bundles_post_ra>
// kernel: conv_block_forward.1
= control target key start
LH: loop header
LB: loop body
LE: loop exit
PB: predicated region body
PF: predicated region fallthrough
CT: control target
= control target key end

     0   :  { %s2236_s21 = smov 0   ;;  %s2238_s22 = smov 0   ;;  %s2476_s0 = inlined_call_operand.vmem [shape: f32[2,2,4,280], index: 0, kind: input, shape index: {}]   ;;  %s2477_s1 = inlined_call_operand.vmem [shape: f32[2,1,220], index: 1, kind: input, shape index: {}]   ;;  %s2478_s2 = inlined_call_operand.vmem [shape: f32[9,8,4], index: 2, kind: input, shape index: {}]   ;;  %s2479_s3 = inlined_call_operand.vmem [shape: f32[8,1], index: 3, kind: input, shape index: {}]   ;;  %s2480_s4 = inlined_call_operand.vmem [shape: f32[9,8,8], index: 4, kind: input, shape index: {}]   ;;  %s2481_s5 = inlined_call_operand.vmem [shape: f32[8,1], index: 5, kind: input, shape index: {}]   ;;  %s2482_s6 = inlined_call_operand.vmem [shape: f32[2,2,8,160], index: 6, kind: output, shape index: {}]  }
   0x1   :  { %s2240_s23 = smov 0   ;;  %s2242_s24 = smov 0  }
   0x2   :  { %s2244_s25 = smov 0  }
   0x3 LB: > { %s25_s26 = sadd.s32 1, %s2181_s23  ;;  %s28_s27 = sadd.s32 1, %s2185_s24  ;;  %s2189_s25 = sphi %s2244_s25, %s16_s25   ;;  %s2185_s24 = sphi %s2242_s24, %s2486_s24   ;;  %s2181_s23 = sphi %s2240_s23, %s2485_s23   ;;  %s2177_s22 = sphi %s2238_s22, %s2484_s22   ;;  %s2173_s21 = sphi %s2236_s21, %s2483_s21  }
   0x4   : > { %p26_p0 = scmp.ge.s32.totalorder %s25_s26, 2  ;;  %p2036_p1 = scmp.ge.s32.totalorder %s2189_s25, 1 }
   0x5   : > { %p241_p2 = scmp.lt.s32.totalorder %s2189_s25, 5 }
   0x6   : > { %s2488_s26 = smov (%p26_p0, %s25_s26), 0  ;;  %s2490_s27 = smov (!%p26_p0, %s28_s27), %s2185_s24 }
   0x7   : > { %p242_p3 = pnand %p2036_p1, %p241_p2  ;;  %p30_p4 = scmp.ge.s32.totalorder %s2490_s27, 2 }
   0x8   : > { %p283_p5 = scmp.lt.s32.totalorder (!%p242_p3), %s2177_s22, 1  ;;  %p285_p6 = scmp.lt.s32.totalorder (!%p242_p3), %s2173_s21, 1 }
   0x9   : > { %s2492_s27 = smov (%p30_p4, %s2490_s27), 0  ;;  %245 = sbr.rel (%p242_p3) target bundleno = 733 (0x2dd), region = 44 }
   0xa   : > { %s2192_s11 = smov (!%p242_p3), 126   ;;  %s2193_s12 = smov (!%p242_p3), 127  }
   0xb   : > { %s2194_s15 = smov (!%p242_p3), 108   ;;  %s2195_s16 = smov (!%p242_p3), 107  }
   0xc   : > { %s2196_s17 = smov (!%p242_p3), 106   ;;  %s2197_s18 = smov (!%p242_p3), 88  }
   0xd   : > { %s2198_s19 = smov (!%p242_p3), 87   ;;  %s2200_s20 = smov (!%p242_p3), 86  }
   0xe   : > { %s2494_s22 = smov (!%p283_p5, %s2177_s22), 1  ;;  %s2496_s21 = smov (!%p285_p6, %s2173_s21), 1  ;;  %v2191_v0 = vmov 0.0   ;;  %vm321_vm0 = vcmask 1043456   ;;  %v306_v3 = vld [vmem:[%s2478_s2] sm:$0xff]  ;;  %vm317_vm1 = vcmask 31744  }
   0xf   : > { %s2097_s28 = smul.u32 6, %s2494_s22  ;;  %468 = vmatprep.mubr.f32.mxu1 %v2191_v0  ;;  %390 = vmatprep.mubr.f32.mxu0 %v2191_v0  ;;  %v2199_v6 = vmov 0   ;;  %v1127_v8 = vld [vmem:[%s2479_s3] sm:$0xff]  ;;  %vm575_vm2 = vcmask 883712   ;;  %v2053_v15 = vld [vmem:[%s2478_s2 + $0x18] sm:$0xff]  ;;  %vm315_vm3 = vcmask 1039360  }
  0x10   : > { %s2096_s29 = smul.u32 3, %s2496_s21  ;;  %2148 = vset.pattern.permute.xlu1 %v2199_v6  ;;  %2149 = vset.pattern.permute.xlu0 %v2199_v6  ;;  %vm484_vm4 = vcmask 1031168   ;;  %v2042_v19 = vld [vmem:[%s2478_s2 + $0x8] sm:$0xff]  ;;  %vm757_vm5 = vcmask 867328   ;;  %vm666_vm6 = vcmask 875520   ;;  %v2049_v24 = vld [vmem:[%s2478_s2 + $0x10] sm:$0xff]  ;;  %v1139_v6 = vlaneseq }
  0x11   : > { %v2061_v25 = vld [vmem:[%s2478_s2 + $0x28] sm:$0xff]  ;;  %vm852_vm7 = vcmask 719872   ;;  %v2057_v30 = vld [vmem:[%s2478_s2 + $0x20] sm:$0xff]  ;;  %v2065_v34 = vld [vmem:[%s2478_s2 + $0x30] sm:$0xff]  ;;  %vm948_vm8 = vcmask 711680   ;;  %vm1044_vm9 = vcmask 703488  }
  0x12   : > { %s289_s30 = sadd.s32 %s2097_s28, %s2096_s29  ;;  %v2069_v40 = vld [vmem:[%s2478_s2 + $0x38] sm:$0xff]  ;;  %v2073_v45 = vld [vmem:[%s2478_s2 + $0x40] sm:$0xff]  ;;  %s2038_s28 = sshll.u32 %s2496_s21, 1  ;;  %vm1152_vm10 = vcmask 752640   ;;  %vm1168_vm11 = vcmask 64512   ;;  %vm1923_vm12 = vcmask 261120  }
  0x13   : > { %s2037_s7 = sshll.u32 %s289_s30, 2 }
  0x14   : > { %s2277_s10 = scalar_lea.vmem %s2476_s0, %s2037_s7  ;;  %s295_s7 = scalar_lea.vmem %s2477_s1, %s2038_s28 }
  0x15   : > { %v475_v1 = vld [vmem:[%s2277_s10] sm:$0xff]  ;;  %v840_v4 = vld [vmem:[%s2277_s10 + $0x8] sm:$0xf] }
  0x16   : > { %480 = vrot.lane.b32.xlu1 %v475_v1, %s2192_s11  ;;  %v479_v2 = vcombine.high %v475_v1, %v475_v1  ;;  %311 = vrot.lane.b32.xlu0 %v475_v1, %s2193_s12  ;;  %v936_v5 = vld [vmem:[%s2277_s10 + $0x8] sm:$0xf] }
  0x17   : > { %v1032_v7 = vld [vmem:[%s2277_s10 + $0x8] sm:$0xf] }
  0x18   : > { %2046 = vmatprep.subr.msk.mxu1 %vm321_vm0, %v479_v2 }
  0x19   : > { %2047 = vmatpush1.msk.msra.mxu1 %vm321_vm0, %v475_v1 }
  0x1a   : > { %482 = vrot.lane.b32.xlu1 %v479_v2, %s2192_s11  ;;  %571 = vrot.lane.b32.xlu0 %v475_v1, %s2194_s15 }
  0x1b   : > { %2048 = vmatmul.mubr.msk.f32.vlgmr.msra.gmra.mxu1 %vm317_vm1, %v306_v3 }
  0x1c   : > { %648 = vmatprep.mubr.f32.mxu1 %v2191_v0 }
  0x1e   : > { %573 = vrot.lane.b32.xlu1 %v479_v2, %s2194_s15  ;;  %662 = vrot.lane.b32.xlu0 %v475_v1, %s2195_s16 }
  0x22   : > { %664 = vrot.lane.b32.xlu1 %v479_v2, %s2195_s16  ;;  %313 = vrot.lane.b32.xlu0 %v479_v2, %s2193_s12 }
  0x26   : > { %755 = vrot.lane.b32.xlu1 %v479_v2, %s2196_s17  ;;  %753 = vrot.lane.b32.xlu0 %v475_v1, %s2196_s17 }
  0x2a   : > { %850 = vrot.lane.b32.xlu1 %v840_v4, %s2197_s18  ;;  %848 = vrot.lane.b32.xlu0 %v479_v2, %s2197_s18 }
  0x2e   : > { %944 = vrot.lane.b32.xlu1 %v479_v2, %s2198_s19  ;;  %846 = vrot.lane.b32.xlu0 %v475_v1, %s2197_s18 }
  0x32   : > { %942 = vrot.lane.b32.xlu1 %v475_v1, %s2198_s19  ;;  %946 = vrot.lane.b32.xlu0 %v936_v5, %s2198_s19 }
  0x36   : > { %1042 = vrot.lane.b32.xlu1 %v1032_v7, %s2200_s20  ;;  %1040 = vrot.lane.b32.xlu0 %v479_v2, %s2200_s20 }
  0x3a   : > { %1038 = vrot.lane.b32.xlu0 %v475_v1, %s2200_s20  ;;  %1130 = vperm.xlu1 %2148, %v1127_v8  }
  0x88   : > { %v481_v9 = vpop.permute.xlu1 %480  ;;  %v312_v10 = vpop.permute.xlu0 %311 }
  0x8c   : > { %v483_v11 = vpop.permute.xlu1 %482  ;;  %v572_v12 = vpop.permute.xlu0 %571 }
  0x8d   : > { %v485_v21 = vsel %vm484_vm4, %v481_v9, %v483_v11 }
  0x90   : > { %v574_v13 = vpop.permute.xlu1 %573  ;;  %v663_v14 = vpop.permute.xlu0 %662 }
  0x91   : > { %v576_v16 = vsel %vm575_vm2, %v572_v12, %v574_v13  ;;  %2054 = vmatprep.subr.msk.mxu1 %vm321_vm0, %v574_v13 }
  0x92   : > { %2055 = vmatpush1.msk.msra.mxu1 %vm321_vm0, %v576_v16 }
  0x93   : > { %2056 = vmatmul.mubr.msk.f32.vlgmr.msra.gmra.mxu1 %vm317_vm1, %v2053_v15 }
  0x94   : > { %v665_v17 = vpop.permute.xlu1 %664  ;;  %v314_v18 = vpop.permute.xlu0 %313  ;;  %830 = vmatprep.mubr.f32.mxu1 %v2191_v0 }
  0x95   : > { %2043 = vmatprep.subr.msk.mxu0 %vm321_vm0, %v314_v18  ;;  %v316_v20 = vsel %vm315_vm3, %v312_v10, %v314_v18  ;;  %v667_v27 = vsel %vm666_vm6, %v663_v14, %v665_v17 }
  0x96   : > { %2044 = vmatpush1.msk.msra.mxu0 %vm321_vm0, %v316_v20 }
  0x97   : > { %2045 = vmatmul.mubr.msk.f32.vlgmr.msra.gmra.mxu0 %vm317_vm1, %v2042_v19  ;;  %2050 = vmatprep.subr.msk.mxu0 %vm321_vm0, %v483_v11  ;;  %v1140_v11 = vshrl.u32 %v1139_v6, 7 }
  0x98   : > { %v756_v22 = vpop.permute.xlu1 %755  ;;  %2051 = vmatpush1.msk.msra.mxu0 %vm321_vm0, %v485_v21  ;;  %v754_v23 = vpop.permute.xlu0 %753  ;;  %557 = vmatprep.mubr.f32.mxu0 %v2191_v0 }
  0x99   : > { %v758_v26 = vsel %vm757_vm5, %v754_v23, %v756_v22  ;;  %2058 = vmatprep.subr.msk.mxu0 %vm321_vm0, %v665_v17  ;;  %2062 = vmatprep.subr.msk.mxu1 %vm321_vm0, %v756_v22  ;;  %v1141_v15 = vsub.s32 0, %v1140_v11  ;;  %v1137_v17 = vld [vmem:[%s295_s7] sm:$0x3]  ;;  %v1145_v21 = vsub.s32 1, %v1140_v11 }
  0x9a   : > { %2063 = vmatpush1.msk.msra.mxu1 %vm321_vm0, %v758_v26 }
  0x9b   : > { %2052 = vmatmul.mubr.msk.f32.vlgmr.msra.gmra.mxu0 %vm317_vm1, %v2049_v24  ;;  %2064 = vmatmul.mubr.msk.f32.vlgmr.msra.gmra.mxu1 %vm317_vm1, %v2061_v25  ;;  %v1142_v23 = vrot.slane %v1137_v17, %v1141_v15 }
  0x9c   : > { %2059 = vmatpush1.msk.msra.mxu0 %vm321_vm0, %v667_v27  ;;  %v851_v28 = vpop.permute.xlu1 %850  ;;  %v849_v29 = vpop.permute.xlu0 %848  ;;  %739 = vmatprep.mubr.f32.mxu0 %v2191_v0 }
  0x9d   : > { %v854_v31 = vsel %vm852_vm7, %v849_v29, %v851_v28  ;;  %1022 = vmatprep.mubr.f32.mxu1 %v2191_v0  ;;  %v1146_v28 = vrot.slane %v1137_v17, %v1145_v21 }
  0x9e   : > { %2066 = vmatprep.subr.msk.mxu0 %vm321_vm0, %v854_v31 }
  0x9f   : > { %2060 = vmatmul.mubr.msk.f32.vlgmr.msra.gmra.mxu0 %vm317_vm1, %v2057_v30 }
  0xa0   : > { %v945_v32 = vpop.permute.xlu1 %944  ;;  %v847_v33 = vpop.permute.xlu0 %846  ;;  %926 = vmatprep.mubr.f32.mxu0 %v2191_v0 }
  0xa1   : > { %v853_v35 = vsel %vm852_vm7, %v847_v33, %v849_v29  ;;  %v1156_v33 = vld [vmem:[%s2480_s4] sm:$0xff] }
  0xa2   : > { %2067 = vmatpush1.msk.msra.mxu0 %vm321_vm0, %v853_v35 }
  0xa3   : > { %2068 = vmatmul.mubr.msk.f32.vlgmr.msra.gmra.mxu0 %vm317_vm1, %v2065_v34  ;;  %v1912_v34 = vld [vmem:[%s2481_s5] sm:$0xff] }
  0xa4   : > { %v943_v36 = vpop.permute.xlu1 %942  ;;  %v947_v37 = vpop.permute.xlu0 %946  ;;  %1118 = vmatprep.mubr.f32.mxu0 %v2191_v0 }
  0xa5   : > { %v949_v38 = vsel %vm948_vm8, %v943_v36, %v945_v32  ;;  %v950_v39 = vsel %vm948_vm8, %v945_v32, %v947_v37 }
  0xa6   : > { %2070 = vmatprep.subr.msk.mxu1 %vm321_vm0, %v950_v39  ;;  %v2077_v39 = vld [vmem:[%s2480_s4 + $0x8] sm:$0xff] }
  0xa7   : > { %2071 = vmatpush1.msk.msra.mxu1 %vm321_vm0, %v949_v38 }
  0xa8   : > { %v1043_v41 = vpop.permute.xlu1 %1042  ;;  %v1041_v42 = vpop.permute.xlu0 %1040  ;;  %2072 = vmatmul.mubr.msk.f32.vlgmr.msra.gmra.mxu1 %vm317_vm1, %v2069_v40 }
  0xa9   : > { %v1046_v43 = vsel %vm1044_vm9, %v1041_v42, %v1043_v41  ;;  %1236 = vmatprep.mubr.f32.mxu1 %v2191_v0 }
  0xaa   : > { %2074 = vmatprep.subr.msk.mxu0 %vm321_vm0, %v1046_v43  ;;  %v2080_v43 = vld [vmem:[%s2480_s4 + $0x10] sm:$0xff] }
  0xac   : > { %v1039_v44 = vpop.permute.xlu0 %1038 }
  0xad   : > { %v1045_v46 = vsel %vm1044_vm9, %v1039_v44, %v1041_v42 }
  0xae   : > { %2075 = vmatpush1.msk.msra.mxu0 %vm321_vm0, %v1045_v46  ;;  %v2082_v46 = vld [vmem:[%s2480_s4 + $0x18] sm:$0xff] }
  0xaf   : > { %2076 = vmatmul.mubr.msk.f32.vlgmr.msra.gmra.mxu0 %vm317_vm1, %v2073_v45 }
  0xb0   : > { %1310 = vmatprep.mubr.f32.mxu0 %v2191_v0 }
  0xb5   : > { %v1131_v18 = vpop.permute.xlu1 %1130 }
  0xdb   : > { %v470_v47 = vpop.f32.mrf.mxu1 }
  0xdd   : > { %v472_v48 = vpop.f32.mrf.mxu1 }
 0x153   : > { %v650_v52 = vpop.f32.mrf.mxu1 }
 0x155   : > { %v652_v57 = vpop.f32.mrf.mxu1 }
 0x157   : > { %v392_v49 = vpop.f32.mrf.mxu0 }
 0x158   : > { %v471_v50 = vadd.f32 %v470_v47, %v392_v49 }
 0x159   : > { %v394_v51 = vpop.f32.mrf.mxu0 }
 0x15a   : > { %v473_v53 = vadd.f32 %v472_v48, %v394_v51 }
 0x15b   : > { %v559_v54 = vpop.f32.mrf.mxu0  ;;  %v832_v63 = vpop.f32.mrf.mxu1 }
 0x15c   : > { %v564_v55 = vadd.f32 %v559_v54, %v471_v50  ;;  %v2084_v50 = vld [vmem:[%s2480_s4 + $0x20] sm:$0xff]  ;;  %v2086_v54 = vld [vmem:[%s2480_s4 + $0x28] sm:$0xff] }
 0x15d   : > { %v561_v56 = vpop.f32.mrf.mxu0  ;;  %v834_v3 = vpop.f32.mrf.mxu1 }
 0x15e   : > { %v565_v58 = vadd.f32 %v561_v56, %v473_v53  ;;  %v655_v59 = vadd.f32 %v650_v52, %v564_v55 }
 0x15f   : > { %v741_v60 = vpop.f32.mrf.mxu0 }
 0x160   : > { %v656_v61 = vadd.f32 %v652_v57, %v565_v58  ;;  %v746_v1 = vadd.f32 %v741_v60, %v655_v59  ;;  %v2088_v57 = vld [vmem:[%s2480_s4 + $0x30] sm:$0xff] }
 0x161   : > { %v743_v62 = vpop.f32.mrf.mxu0 }
 0x162   : > { %v747_v2 = vadd.f32 %v743_v62, %v656_v61  ;;  %v837_v5 = vadd.f32 %v832_v63, %v746_v1  ;;  %v2090_v61 = vld [vmem:[%s2480_s4 + $0x38] sm:$0xff] }
 0x163   : > { %v928_v4 = vpop.f32.mrf.mxu0 }
 0x164   : > { %v838_v7 = vadd.f32 %v834_v3, %v747_v2  ;;  %v933_v10 = vadd.f32 %v928_v4, %v837_v5  ;;  %v2092_v2 = vld [vmem:[%s2480_s4 + $0x40] sm:$0xff] }
 0x165   : > { %v930_v8 = vpop.f32.mrf.mxu0 }
 0x166   : > { %v934_v12 = vadd.f32 %v930_v8, %v838_v7 }
 0x168   : > { %v1024_v9 = vpop.f32.mrf.mxu1 }
 0x169   : > { %v1029_v14 = vadd.f32 %v1024_v9, %v933_v10 }
 0x16a   : > { %v1026_v13 = vpop.f32.mrf.mxu1 }
 0x16b   : > { %v1030_v19 = vadd.f32 %v1026_v13, %v934_v12 }
 0x16f   : > { %v1120_v16 = vpop.f32.mrf.mxu0 }
 0x170   : > { %v1125_v20 = vadd.f32 %v1120_v16, %v1029_v14 }
 0x171   : > { %v1122_v22 = vpop.f32.mrf.mxu0 }
 0x172   : > { %v1133_v24 = vadd.f32 %v1131_v18, %v1125_v20  ;;  %v1126_v25 = vadd.f32 %v1122_v22, %v1030_v19 }
 0x174   : > { %v1135_v26 = vmax.f32 %v1133_v24, 0.0  ;;  %v1134_v27 = vadd.f32 %v1131_v18, %v1126_v25 }
 0x176   : > { %v1149_v29 = vmul.f32 %v1142_v23, %v1135_v26  ;;  %v1136_v30 = vmax.f32 %v1134_v27, 0.0 }
 0x178   : > { %v1150_v31 = vmul.f32 %v1146_v28, %v1136_v30  ;;  %1161 = vrot.lane.b32.xlu0 %v1149_v29, %s2193_s12 }
 0x17a   : > { %1153 = vst.msk [vmem:[#allocation2 + $0x8] sm:$0xff] %vm1152_vm10, %v1150_v31 }
 0x17c   : > { %1319 = vrot.lane.b32.xlu0 %v1149_v29, %s2192_s11 }
 0x180   : > { %1404 = vrot.lane.b32.xlu0 %v1149_v29, %s2194_s15 }
 0x181   : > { %v1155_v32 = vld [vmem:[#allocation2 + $0x8] sm:$0xff] }
 0x182   : > { %1163 = vrot.lane.b32.xlu1 %v1155_v32, %s2193_s12  ;;  %1276 = vmatprep.subr.mxu0 %v1155_v32 }
 0x183   : > { %1277 = vmatpush1.msra.mxu0 %v1149_v29 }
 0x184   : > { %1489 = vrot.lane.b32.xlu0 %v1149_v29, %s2195_s16  ;;  %2079 = vmatmul.mubr.msk.f32.vlgmr.msra.gmra.mxu0 %vm1168_vm11, %v1156_v33 }
 0x185   : > { %1478 = vmatprep.mubr.f32.mxu0 %v2191_v0 }
 0x186   : > { %1321 = vrot.lane.b32.xlu1 %v1155_v32, %s2192_s11  ;;  %s2040_s11 = sshll.u32 %s2494_s22, 2 }
 0x188   : > { %1574 = vrot.lane.b32.xlu0 %v1149_v29, %s2196_s17 }
 0x18a   : > { %1406 = vrot.lane.b32.xlu1 %v1155_v32, %s2194_s15  ;;  %s302_s15 = sadd.s32 %s2040_s11, %s2038_s28 }
 0x18c   : > { %1659 = vrot.lane.b32.xlu0 %v1149_v29, %s2197_s18 }
 0x18e   : > { %1491 = vrot.lane.b32.xlu1 %v1155_v32, %s2195_s16  ;;  %s2041_s16 = sshll.u32 %s302_s15, 3 }
 0x190   : > { %1744 = vrot.lane.b32.xlu0 %v1149_v29, %s2198_s19 }
 0x192   : > { %1576 = vrot.lane.b32.xlu1 %v1155_v32, %s2196_s17 }
 0x194   : > { %1829 = vrot.lane.b32.xlu0 %v1149_v29, %s2200_s20 }
 0x196   : > { %1661 = vrot.lane.b32.xlu1 %v1155_v32, %s2197_s18 }
 0x198   : > { %1915 = vperm.xlu0 %2149, %v1912_v34  }
 0x19a   : > { %1746 = vrot.lane.b32.xlu1 %v1155_v32, %s2198_s19  ;;  %s304_s19 = scalar_lea.vmem %s2482_s6, %s2041_s16 }
 0x19e   : > { %1831 = vrot.lane.b32.xlu1 %v1155_v32, %s2200_s20 }
 0x1ea   : > { %v1162_v35 = vpop.permute.xlu0 %1161 }
 0x1ee   : > { %v1320_v36 = vpop.permute.xlu0 %1319 }
 0x1f2   : > { %v1405_v37 = vpop.permute.xlu0 %1404 }
 0x1f4   : > { %v1164_v38 = vpop.permute.xlu1 %1163 }
 0x1f5   : > { %v1165_v40 = vsel %vm315_vm3, %v1162_v35, %v1164_v38  ;;  %1202 = vmatprep.subr.mxu1 %v1164_v38 }
 0x1f6   : > { %1203 = vmatpush1.msra.mxu1 %v1165_v40  ;;  %v1490_v42 = vpop.permute.xlu0 %1489 }
 0x1f7   : > { %2078 = vmatmul.mubr.msk.f32.vlgmr.msra.gmra.mxu1 %vm1168_vm11, %v2077_v39 }
 0x1f8   : > { %v1322_v41 = vpop.permute.xlu1 %1321  ;;  %1393 = vmatprep.mubr.f32.mxu1 %v2191_v0 }
 0x1f9   : > { %v1323_v44 = vsel %vm484_vm4, %v1320_v36, %v1322_v41  ;;  %1359 = vmatprep.subr.mxu1 %v1322_v41 }
 0x1fa   : > { %1360 = vmatpush1.msra.mxu1 %v1323_v44  ;;  %v1575_v48 = vpop.permute.xlu0 %1574 }
 0x1fb   : > { %2081 = vmatmul.mubr.msk.f32.vlgmr.msra.gmra.mxu1 %vm1168_vm11, %v2080_v43 }
 0x1fc   : > { %v1407_v45 = vpop.permute.xlu1 %1406  ;;  %1563 = vmatprep.mubr.f32.mxu1 %v2191_v0 }
 0x1fd   : > { %v1408_v47 = vsel %vm575_vm2, %v1405_v37, %v1407_v45  ;;  %1444 = vmatprep.subr.mxu0 %v1407_v45 }
 0x1fe   : > { %1445 = vmatpush1.msra.mxu0 %v1408_v47  ;;  %v1660_v53 = vpop.permute.xlu0 %1659 }
 0x1ff   : > { %2083 = vmatmul.mubr.msk.f32.vlgmr.msra.gmra.mxu0 %vm1168_vm11, %v2082_v46 }
 0x200   : > { %v1492_v49 = vpop.permute.xlu1 %1491  ;;  %1648 = vmatprep.mubr.f32.mxu0 %v2191_v0 }
 0x201   : > { %v1493_v51 = vsel %vm666_vm6, %v1490_v42, %v1492_v49  ;;  %1529 = vmatprep.subr.mxu1 %v1492_v49 }
 0x202   : > { %1530 = vmatpush1.msra.mxu1 %v1493_v51  ;;  %v1745_v59 = vpop.permute.xlu0 %1744 }
 0x203   : > { %2085 = vmatmul.mubr.msk.f32.vlgmr.msra.gmra.mxu1 %vm1168_vm11, %v2084_v50 }
 0x204   : > { %v1577_v52 = vpop.permute.xlu1 %1576  ;;  %1733 = vmatprep.mubr.f32.mxu1 %v2191_v0 }
 0x205   : > { %v1578_v55 = vsel %vm757_vm5, %v1575_v48, %v1577_v52  ;;  %1614 = vmatprep.subr.mxu0 %v1577_v52 }
 0x206   : > { %1615 = vmatpush1.msra.mxu0 %v1578_v55  ;;  %v1830_v63 = vpop.permute.xlu0 %1829 }
 0x207   : > { %2087 = vmatmul.mubr.msk.f32.vlgmr.msra.gmra.mxu0 %vm1168_vm11, %v2086_v54 }
 0x208   : > { %v1662_v56 = vpop.permute.xlu1 %1661  ;;  %1818 = vmatprep.mubr.f32.mxu0 %v2191_v0 }
 0x209   : > { %v1663_v58 = vsel %vm852_vm7, %v1660_v53, %v1662_v56  ;;  %1699 = vmatprep.subr.mxu1 %v1662_v56 }
 0x20a   : > { %1700 = vmatpush1.msra.mxu1 %v1663_v58 }
 0x20b   : > { %2089 = vmatmul.mubr.msk.f32.vlgmr.msra.gmra.mxu1 %vm1168_vm11, %v2088_v57 }
 0x20c   : > { %v1747_v60 = vpop.permute.xlu1 %1746  ;;  %1903 = vmatprep.mubr.f32.mxu1 %v2191_v0 }
 0x20d   : > { %v1748_v62 = vsel %vm948_vm8, %v1745_v59, %v1747_v60  ;;  %1784 = vmatprep.subr.mxu0 %v1747_v60 }
 0x20e   : > { %1785 = vmatpush1.msra.mxu0 %v1748_v62 }
 0x20f   : > { %2091 = vmatmul.mubr.msk.f32.vlgmr.msra.gmra.mxu0 %vm1168_vm11, %v2090_v61 }
 0x210   : > { %v1832_v1 = vpop.permute.xlu1 %1831 }
 0x211   : > { %v1833_v3 = vsel %vm1044_vm9, %v1830_v63, %v1832_v1  ;;  %1869 = vmatprep.subr.mxu1 %v1832_v1 }
 0x212   : > { %1870 = vmatpush1.msra.mxu1 %v1833_v3 }
 0x213   : > { %2093 = vmatmul.mubr.msk.f32.vlgmr.msra.gmra.mxu1 %vm1168_vm11, %v2092_v2  ;;  %v1916_v33 = vpop.permute.xlu0 %1915 }
 0x244   : > { %v1312_v0 = vpop.f32.mrf.mxu0 }
 0x246   : > { %v1314_v7 = vpop.f32.mrf.mxu0 }
 0x2b7   : > { %v1238_v4 = vpop.f32.mrf.mxu1 }
 0x2b8   : > { %v1313_v6 = vadd.f32 %v1312_v0, %v1238_v4 }
 0x2b9   : > { %v1240_v5 = vpop.f32.mrf.mxu1 }
 0x2ba   : > { %v1315_v9 = vadd.f32 %v1314_v7, %v1240_v5 }
 0x2bb   : > { %v1395_v8 = vpop.f32.mrf.mxu1 }
 0x2bc   : > { %v1400_v10 = vadd.f32 %v1395_v8, %v1313_v6 }
 0x2bd   : > { %v1397_v11 = vpop.f32.mrf.mxu1 }
 0x2be   : > { %v1401_v13 = vadd.f32 %v1397_v11, %v1315_v9 }
 0x2bf   : > { %v1480_v12 = vpop.f32.mrf.mxu0 }
 0x2c0   : > { %v1485_v14 = vadd.f32 %v1480_v12, %v1400_v10 }
 0x2c1   : > { %v1482_v15 = vpop.f32.mrf.mxu0 }
 0x2c2   : > { %v1486_v17 = vadd.f32 %v1482_v15, %v1401_v13 }
 0x2c3   : > { %v1565_v16 = vpop.f32.mrf.mxu1 }
 0x2c4   : > { %v1570_v18 = vadd.f32 %v1565_v16, %v1485_v14 }
 0x2c5   : > { %v1567_v19 = vpop.f32.mrf.mxu1 }
 0x2c6   : > { %v1571_v21 = vadd.f32 %v1567_v19, %v1486_v17 }
 0x2c7   : > { %v1650_v20 = vpop.f32.mrf.mxu0 }
 0x2c8   : > { %v1655_v22 = vadd.f32 %v1650_v20, %v1570_v18 }
 0x2c9   : > { %v1652_v23 = vpop.f32.mrf.mxu0 }
 0x2ca   : > { %v1656_v25 = vadd.f32 %v1652_v23, %v1571_v21 }
 0x2cb   : > { %v1735_v24 = vpop.f32.mrf.mxu1 }
 0x2cc   : > { %v1740_v26 = vadd.f32 %v1735_v24, %v1655_v22 }
 0x2cd   : > { %v1737_v27 = vpop.f32.mrf.mxu1 }
 0x2ce   : > { %v1741_v30 = vadd.f32 %v1737_v27, %v1656_v25 }
 0x2cf   : > { %v1820_v28 = vpop.f32.mrf.mxu0 }
 0x2d0   : > { %v1825_v31 = vadd.f32 %v1820_v28, %v1740_v26 }
 0x2d1   : > { %v1822_v29 = vpop.f32.mrf.mxu0 }
 0x2d2   : > { %v1826_v34 = vadd.f32 %v1822_v29, %v1741_v30 }
 0x2d3   : > { %v1905_v32 = vpop.f32.mrf.mxu1 }
 0x2d4   : > { %v1910_v35 = vadd.f32 %v1905_v32, %v1825_v31 }
 0x2d5   : > { %v1907_v36 = vpop.f32.mrf.mxu1 }
 0x2d6   : > { %v1911_v37 = vadd.f32 %v1907_v36, %v1826_v34  ;;  %v1918_v38 = vadd.f32 %v1916_v33, %v1910_v35 }
 0x2d8   : > { %v1919_v39 = vadd.f32 %v1916_v33, %v1911_v37  ;;  %v1920_v40 = vmax.f32 %v1918_v38, 0.0 }
 0x2da   : > { %v1921_v41 = vmax.f32 %v1919_v39, 0.0  ;;  %1922 = vst [vmem:[%s304_s19] sm:$0xff] %v1920_v40 }
 0x2dc   : > { %1924 = vst.msk [vmem:[%s304_s19 + $0x8] sm:$0xff] %vm1923_vm12, %v1921_v41 }
 0x2dd PF: > { %s16_s25 = sadd.s32 1, %s2189_s25   ;;  %s2483_s21 = smov %s2181_s23 }
 0x2de   : > { %p13_p7 = scmp.ge.s32.totalorder %s16_s25, 6   ;;  %s2484_s22 = smov %s2185_s24 }
 0x2df   : > { %s2485_s23 = smov %s2488_s26  ;;  %s2486_s24 = smov %s2492_s27 }
 0x2e0   :  { %15 = sbr.rel (!%p13_p7) target bundleno = 3 (0x3), region = 93 }

</bundles_post_ra>
